<compile_context>
chip_gen: v6e
topology: v6e:2x2x1
jax: 0.10.0
libtpu: 0.0.40
codegen_flags: <defaults>
</compile_context>

<pallas_src>
import functools

import jax
import jax.numpy as jnp
from jax.experimental import pallas as pl
from jax.experimental.pallas import tpu as pltpu


def _round_up(x, m):
    return (x + m - 1) // m * m


# ----------------------------------------------------------------------------
# Pallas kernel: fused 3-layer MLP, feature-major (features on sublanes,
# batch on the 128-lane axis).
# ----------------------------------------------------------------------------
def _mlp_kernel(yT_ref, w1_ref, b1_ref, w2_ref, b2_ref, w3_ref, out_ref):
    # layer 1: (H, Din) @ (Din, Bt) -> (H, Bt), +bias (broadcast over lanes), tanh
    h = jnp.dot(w1_ref[...], yT_ref[...], preferred_element_type=jnp.float32)
    h = jnp.tanh(h + b1_ref[...])
    # layer 2: (H, H) @ (H, Bt) -> (H, Bt), +bias, tanh
    h = jnp.dot(w2_ref[...], h, preferred_element_type=jnp.float32)
    h = jnp.tanh(h + b2_ref[...])
    # layer 3 (no bias): (Dout, H) @ (H, Bt) -> (Dout, Bt), lane-dense store
    out_ref[...] = jnp.dot(w3_ref[...], h, preferred_element_type=jnp.float32)


# ----------------------------------------------------------------------------
# Batch tiling: batch sits on the lane axis -> tiles are multiples of 128.
# Grid length is kept even so v7x's two TensorCores split the batch evenly.
# ----------------------------------------------------------------------------
def _choose_batch_tiling(B, max_block_b):
    Bp = _round_up(B, 128)
    if Bp <= 128:
        return 128, 128                       # single tiny block; nothing to split
    grid_n = _round_up(pl.cdiv(Bp, max_block_b), 2)   # even grid (v7x dual-TC)
    block_b = _round_up(pl.cdiv(Bp, grid_n), 128)
    return block_b, block_b * grid_n


# ----------------------------------------------------------------------------
# Wrapper: pallas_call with pinned weights; only the tiny y / out transposes
# happen per call (weights need no padding or casting in this layout).
# ----------------------------------------------------------------------------
@functools.partial(jax.jit, static_argnames=("max_block_b",))
def mlp_forward(y, w1, b1, w2, b2, w3, *, max_block_b=4096):
    """y: (B, Din) f32.  w1:(H,Din) w2:(H,H) w3:(Dout,H) [PyTorch layout].
    b1,b2: (H,1)."""
    B, Din = y.shape
    H = w1.shape[0]
    Dout = w3.shape[0]

    block_b, Bp = _choose_batch_tiling(B, max_block_b)
    grid = (Bp // block_b,)

    # feature-major input: (Din, Bp), batch on lanes (tiny transpose in wrapper)
    yT = jnp.pad(y, ((0, Bp - B), (0, 0))).T

    act_spec = pl.BlockSpec((Din, block_b), lambda i: (0, i))
    const = lambda a: pl.BlockSpec(a.shape, lambda i: (0, 0))   # VMEM-resident
    out_spec = pl.BlockSpec((Dout, block_b), lambda i: (0, i))

    flops = 2 * Bp * (Din * H + H * H + H * Dout)
    transcendentals = 2 * Bp * H
    bytes_accessed = (
        yT.size * yT.dtype.itemsize
        + sum(a.size * a.dtype.itemsize for a in (w1, b1, w2, b2, w3))
        + Dout * Bp * 4
    )

    out = pl.pallas_call(
        _mlp_kernel,
        out_shape=jax.ShapeDtypeStruct((Dout, Bp), jnp.float32),
        grid=grid,
        in_specs=[
            act_spec,
            const(w1), const(b1), const(w2), const(b2), const(w3),
        ],
        out_specs=out_spec,
        compiler_params=pltpu.CompilerParams(
            dimension_semantics=("parallel",),      # batch axis across v7x TCs
            vmem_limit_bytes=32 * 1024 * 1024,
        ),
        cost_estimate=pl.CostEstimate(
            flops=flops,
            transcendentals=transcendentals,
            bytes_accessed=bytes_accessed,
        ),
    )(yT, w1, b1, w2, b2, w3)

    # strip batch padding, transpose back to (B, Dout) — only Dout*Bp*4 bytes
    return out[:, :B].T


# ----------------------------------------------------------------------------
# Deterministic parameter init (mirrors torch.nn.init.orthogonal_ semantics)
# ----------------------------------------------------------------------------
def orthogonal_weight(key, out_features, in_features):
    """Orthogonal init, returned in PyTorch layout (out_features, in_features)."""
    rows, cols = out_features, in_features
    transposed = rows < cols
    if transposed:
        rows, cols = cols, rows
    a = jax.random.normal(key, (rows, cols), dtype=jnp.float32)
    q, r = jnp.linalg.qr(a)
    d = jnp.sign(jnp.diagonal(r))
    q = q * d[None, :]
    return q.T if transposed else q


def init_mlp_params(key, input_dim, hidden_dim, output_dim):
    k1, k2, k3, k4, k5 = jax.random.split(key, 5)
    w1 = orthogonal_weight(k1, hidden_dim, input_dim)    # (H, Din)
    w2 = orthogonal_weight(k2, hidden_dim, hidden_dim)   # (H, H)
    w3 = orthogonal_weight(k3, output_dim, hidden_dim)   # (Dout, H)
    # torch.nn.Linear default bias ~ U(-1/sqrt(fan_in), 1/sqrt(fan_in)); (H,1) layout.
    b1 = jax.random.uniform(k4, (hidden_dim, 1), jnp.float32,
                            -1.0 / jnp.sqrt(input_dim), 1.0 / jnp.sqrt(input_dim))
    b2 = jax.random.uniform(k5, (hidden_dim, 1), jnp.float32,
                            -1.0 / jnp.sqrt(hidden_dim), 1.0 / jnp.sqrt(hidden_dim))
    return w1, b1, w2, b2, w3


# ----------------------------------------------------------------------------
# Pure-JAX reference for correctness checks
# ----------------------------------------------------------------------------
def mlp_reference(y, w1, b1, w2, b2, w3):
    h = jnp.tanh(y @ w1.T + b1[:, 0])
    h = jnp.tanh(h @ w2.T + b2[:, 0])
    return h @ w3.T


if __name__ == "__main__":
    key = jax.random.PRNGKey(0)
    k_in, k_in2, k_params = jax.random.split(key, 3)

    # Double-pendulum HNN sizes: input (q1, q2, p1, p2) = 4, hidden 32, output 2.
    batch, input_dim, hidden_dim, output_dim = 8, 4, 32, 2
    params = init_mlp_params(k_params, input_dim, hidden_dim, output_dim)

    # --- small batch (single 128-wide block, grid = 1) ---
    y = jax.random.normal(k_in, (batch, input_dim), dtype=jnp.float32)
    out = jax.block_until_ready(mlp_forward(y, *params))
    ref = mlp_reference(y, *params)
    assert out.shape == (batch, output_dim)
    assert jnp.allclose(out, ref, atol=1e-5, rtol=1e-5), "mismatch vs reference"

    # --- larger batch exercising grid tiling + batch padding (1000 -> 2 x 512) ---
    y_big = jax.random.normal(k_in2, (1000, input_dim), dtype=jnp.float32)
    out_big = jax.block_until_ready(mlp_forward(y_big, *params))
    ref_big = mlp_reference(y_big, *params)
    assert out_big.shape == (1000, output_dim)
    assert jnp.allclose(out_big, ref_big, atol=1e-5, rtol=1e-5), "mismatch (tiled)"

    print("KERNEL_OK")
</pallas_src>

<mosaic_0001>
module attributes {stable_mosaic.version = 11 : i64} {
  func.func @_mlp_kernel(%arg0: i32, %arg1: memref<4x128xf32, #tpu.memory_space<vmem>>, %arg2: memref<32x4xf32, #tpu.memory_space<vmem>>, %arg3: memref<32x1xf32, #tpu.memory_space<vmem>>, %arg4: memref<32x32xf32, #tpu.memory_space<vmem>>, %arg5: memref<32x1xf32, #tpu.memory_space<vmem>>, %arg6: memref<2x32xf32, #tpu.memory_space<vmem>>, %arg7: memref<2x128xf32, #tpu.memory_space<vmem>>) attributes {dimension_semantics = [#tpu.dimension_semantics<parallel>], iteration_bounds = array<i64: 1>, scalar_prefetch = 0 : i64, scratch_operands = 0 : i64, tpu.core_type = #tpu.core_type<tc>, window_params = [{transform_indices = @transform_0, window_bounds = array<i64: 4, 128>}, {pipeline_mode = #tpu.pipeline_mode<synchronous>, transform_indices = @transform_1, window_bounds = array<i64: 32, 4>}, {pipeline_mode = #tpu.pipeline_mode<synchronous>, transform_indices = @transform_2, window_bounds = array<i64: 32, 1>}, {pipeline_mode = #tpu.pipeline_mode<synchronous>, transform_indices = @transform_3, window_bounds = array<i64: 32, 32>}, {pipeline_mode = #tpu.pipeline_mode<synchronous>, transform_indices = @transform_4, window_bounds = array<i64: 32, 1>}, {pipeline_mode = #tpu.pipeline_mode<synchronous>, transform_indices = @transform_5, window_bounds = array<i64: 2, 32>}, {transform_indices = @transform_6, window_bounds = array<i64: 2, 128>}]} {
    %c0 = arith.constant 0 : index
    %c0_0 = arith.constant 0 : index
    %0 = vector.load %arg2[%c0, %c0_0] : memref<32x4xf32, #tpu.memory_space<vmem>>, vector<32x4xf32>
    %c0_1 = arith.constant 0 : index
    %c0_2 = arith.constant 0 : index
    %1 = vector.load %arg1[%c0_1, %c0_2] : memref<4x128xf32, #tpu.memory_space<vmem>>, vector<4x128xf32>
    %cst = arith.constant dense<0.000000e+00> : vector<32x128xf32>
    %2 = tpu.matmul %0, %1, %cst {dimension_numbers = #tpu.dot_dimension_numbers<[1], [0], [0], [1], [0, 0, 1, 1], [], []>} : vector<32x4xf32>, vector<4x128xf32>, vector<32x128xf32> -> vector<32x128xf32>
    %c0_3 = arith.constant 0 : index
    %c0_4 = arith.constant 0 : index
    %3 = vector.load %arg3[%c0_3, %c0_4] : memref<32x1xf32, #tpu.memory_space<vmem>>, vector<32x1xf32>
    %4 = vector.broadcast %3 : vector<32x1xf32> to vector<32x128xf32>
    %5 = arith.addf %2, %4 : vector<32x128xf32>
    %6 = math.tanh %5 : vector<32x128xf32>
    %c0_5 = arith.constant 0 : index
    %c0_6 = arith.constant 0 : index
    %7 = vector.load %arg4[%c0_5, %c0_6] : memref<32x32xf32, #tpu.memory_space<vmem>>, vector<32x32xf32>
    %cst_7 = arith.constant dense<0.000000e+00> : vector<32x128xf32>
    %8 = tpu.matmul %7, %6, %cst_7 {dimension_numbers = #tpu.dot_dimension_numbers<[1], [0], [0], [1], [0, 0, 1, 1], [], []>} : vector<32x32xf32>, vector<32x128xf32>, vector<32x128xf32> -> vector<32x128xf32>
    %c0_8 = arith.constant 0 : index
    %c0_9 = arith.constant 0 : index
    %9 = vector.load %arg5[%c0_8, %c0_9] : memref<32x1xf32, #tpu.memory_space<vmem>>, vector<32x1xf32>
    %10 = vector.broadcast %9 : vector<32x1xf32> to vector<32x128xf32>
    %11 = arith.addf %8, %10 : vector<32x128xf32>
    %12 = math.tanh %11 : vector<32x128xf32>
    %c0_10 = arith.constant 0 : index
    %c0_11 = arith.constant 0 : index
    %13 = vector.load %arg6[%c0_10, %c0_11] : memref<2x32xf32, #tpu.memory_space<vmem>>, vector<2x32xf32>
    %cst_12 = arith.constant dense<0.000000e+00> : vector<2x128xf32>
    %14 = tpu.matmul %13, %12, %cst_12 {dimension_numbers = #tpu.dot_dimension_numbers<[1], [0], [0], [1], [0, 0, 1, 1], [], []>} : vector<2x32xf32>, vector<32x128xf32>, vector<2x128xf32> -> vector<2x128xf32>
    %c0_13 = arith.constant 0 : index
    %c0_14 = arith.constant 0 : index
    %15 = vector.load %arg7[%c0_13, %c0_14] : memref<2x128xf32, #tpu.memory_space<vmem>>, vector<2x128xf32>
    tpu.vector_store %arg7[%c0_13, %c0_14], %14 {strides = array<i32>} : memref<2x128xf32, #tpu.memory_space<vmem>>, vector<2x128xf32>,
    return
  }
  func.func @transform_0(%arg0: i32) -> (i32, i32) {
    %c0_i32 = arith.constant 0 : i32
    %c0_i32_0 = arith.constant 0 : i32
    return %c0_i32, %arg0 : i32, i32
  }
  func.func @transform_1(%arg0: i32) -> (i32, i32) {
    %c0_i32 = arith.constant 0 : i32
    %c0_i32_0 = arith.constant 0 : i32
    %c0_i32_1 = arith.constant 0 : i32
    return %c0_i32, %c0_i32_0 : i32, i32
  }
  func.func @transform_2(%arg0: i32) -> (i32, i32) {
    %c0_i32 = arith.constant 0 : i32
    %c0_i32_0 = arith.constant 0 : i32
    %c0_i32_1 = arith.constant 0 : i32
    return %c0_i32, %c0_i32_0 : i32, i32
  }
  func.func @transform_3(%arg0: i32) -> (i32, i32) {
    %c0_i32 = arith.constant 0 : i32
    %c0_i32_0 = arith.constant 0 : i32
    %c0_i32_1 = arith.constant 0 : i32
    return %c0_i32, %c0_i32_0 : i32, i32
  }
  func.func @transform_4(%arg0: i32) -> (i32, i32) {
    %c0_i32 = arith.constant 0 : i32
    %c0_i32_0 = arith.constant 0 : i32
    %c0_i32_1 = arith.constant 0 : i32
    return %c0_i32, %c0_i32_0 : i32, i32
  }
  func.func @transform_5(%arg0: i32) -> (i32, i32) {
    %c0_i32 = arith.constant 0 : i32
    %c0_i32_0 = arith.constant 0 : i32
    %c0_i32_1 = arith.constant 0 : i32
    return %c0_i32, %c0_i32_0 : i32, i32
  }
  func.func @transform_6(%arg0: i32) -> (i32, i32) {
    %c0_i32 = arith.constant 0 : i32
    %c0_i32_0 = arith.constant 0 : i32
    return %c0_i32, %arg0 : i32, i32
  }
}

</mosaic_0001>

<bundles_post_ra>
// kernel: mlp_forward.1
= control target key start
LH: loop header
LB: loop body
LE: loop exit
PB: predicated region body
PF: predicated region fallthrough
CT: control target
= control target key end

     0   :  { %vm65_vm0 = vcmask 1043456   ;;  %vm52_vm1 = vcmask 31744   ;;  %v449_v3 = vmov 0   ;;  %vm186_vm2 = vcmask 261120   ;;  %s553_s0 = inlined_call_operand.vmem [shape: f32[4,128], index: 0, kind: input, shape index: {}]   ;;  %s554_s1 = inlined_call_operand.vmem [shape: f32[32,4], index: 1, kind: input, shape index: {}]   ;;  %s555_s2 = inlined_call_operand.vmem [shape: f32[32,1], index: 2, kind: input, shape index: {}]   ;;  %s556_s4 = inlined_call_operand.vmem [shape: f32[32,1], index: 4, kind: input, shape index: {}]   ;;  %s557_s3 = inlined_call_operand.vmem [shape: f32[32,32], index: 3, kind: input, shape index: {}]   ;;  %s558_s5 = inlined_call_operand.vmem [shape: f32[2,32], index: 5, kind: input, shape index: {}]   ;;  %s559_s6 = inlined_call_operand.vmem [shape: f32[2,128], index: 6, kind: output, shape index: {}]  }
   0x1   :  { %v27_v0 = vld [vmem:[%s553_s0] sm:$0xf]  ;;  %v24_v2 = vld [vmem:[%s554_s1 + $0x8] sm:$0xff]  ;;  %431 = vset.pattern.permute.xlu0 %v449_v3  ;;  %432 = vset.pattern.permute.xlu1 %v449_v3  ;;  %v25_v4 = vld [vmem:[%s554_s1 + $0x10] sm:$0xff]  ;;  %v450_v34 = vmov 0.0   ;;  %vm451_vm3 = vmmov 0  }
   0x2   :  { %v23_v1 = vld [vmem:[%s554_s1] sm:$0xff]  ;;  %395 = vmatprep.subr.msk.mxu0 %vm65_vm0, %v27_v0  ;;  %v31_v5 = vld [vmem:[%s555_s2 + $0x18] sm:$0xff]  ;;  %v29_v6 = vld [vmem:[%s555_s2 + $0x8] sm:$0xff] }
   0x3   :  { %397 = vmatprep.mubr.msk.f32.mxu0 %vm52_vm1, %v23_v1  ;;  %396 = vmatpush3.msk.msra.mxu0 %vm65_vm0, %v27_v0  ;;  %v30_v7 = vld [vmem:[%s555_s2 + $0x10] sm:$0xff]  ;;  %v26_v8 = vld [vmem:[%s554_s1 + $0x18] sm:$0xff]  ;;  %v28_v9 = vld [vmem:[%s555_s2] sm:$0xff] }
   0x4   :  { %49 = vperm.xlu0 %431, %v31_v5   ;;  %398 = vmatmul.mubr.msk.f32.vlgmr.msra.gmra.mxu0 %vm52_vm1, %v24_v2  ;;  %v165_v10 = vld [vmem:[%s556_s4 + $0x18] sm:$0xff]  ;;  %v164_v11 = vld [vmem:[%s556_s4 + $0x10] sm:$0xff]  ;;  %v163_v12 = vld [vmem:[%s556_s4 + $0x8] sm:$0xff] }
   0x5   :  { %39 = vperm.xlu1 %432, %v29_v6   ;;  %400 = vmatprep.mubr.msk.f32.mxu0 %vm52_vm1, %v25_v4  ;;  %v162_v13 = vld [vmem:[%s556_s4] sm:$0xff]  ;;  %v159_v31 = vld [vmem:[%s557_s3 + $0x8] sm:$0xff]  ;;  %v160_v32 = vld [vmem:[%s557_s3 + $0x10] sm:$0xff] }
   0x6   :  { %v158_v14 = vld [vmem:[%s557_s3] sm:$0xff]  ;;  %v161_v33 = vld [vmem:[%s557_s3 + $0x18] sm:$0xff]  ;;  %417 = vmatprep.subr.mxu0 %v450_v34 }
   0x7   :  { %411 = vmatprep.mubr.msk.f32.mxu1 %vm186_vm2, %v158_v14  ;;  %v288_v50 = vld [vmem:[%s558_s5] sm:$0x3] }
   0x8   :  { %44 = vperm.xlu0 %431, %v30_v7   ;;  %401 = vmatmul.mubr.msk.f32.gmra.mxu0 %vm52_vm1, %v26_v8 }
   0x9   :  { %34 = vperm.xlu1 %432, %v28_v9   ;;  %425 = vmatprep.mubr.msk.f32.mxu0 %vm451_vm3, %v450_v34 }
   0xc   :  { %183 = vperm.xlu0 %431, %v165_v10  }
   0xd   :  { %178 = vperm.xlu1 %432, %v164_v11  }
  0x10   :  { %173 = vperm.xlu0 %431, %v163_v12  }
  0x11   :  { %168 = vperm.xlu1 %432, %v162_v13  }
  0x7f   :  { %v50_v15 = vpop.permute.xlu0 %49 }
  0x80   :  { %v40_v17 = vpop.permute.xlu1 %39 }
  0x83   :  { %v45_v21 = vpop.permute.xlu0 %44 }
  0x84   :  { %v35_v25 = vpop.permute.xlu1 %34 }
  0x87   :  { %v184_v35 = vpop.permute.xlu0 %183 }
  0x88   :  { %v179_v37 = vpop.permute.xlu1 %178 }
  0x8b   :  { %v174_v41 = vpop.permute.xlu0 %173 }
  0x8c   :  { %v169_v45 = vpop.permute.xlu1 %168 }
  0xc4   :  { %v399_v16 = vpop.f32.mrf.mxu0 }
  0xc5   :  { %v141_v23 = vadd.f32 %v399_v16, %v40_v17 }
  0xc6   :  { %v135_v18 = vpop.f32.mrf.mxu0 }
  0xc7   :  { %v136_v26 = vadd.f32 %v135_v18, %v35_v25 }
  0xc8   :  { %v402_v19 = vpop.f32.mrf.mxu0 }
  0xc9   :  { %v151_v20 = vadd.f32 %v402_v19, %v50_v15 }
  0xca   :  { %v145_v22 = vpop.f32.mrf.mxu0 }
  0xcb   :  { %433 = vtanh.f32 %v151_v20  ;;  %v146_v24 = vadd.f32 %v145_v22, %v45_v21 }
  0xcd   :  { %435 = vtanh.f32 %v146_v24 }
  0xce   :  { %437 = vtanh.f32 %v141_v23 }
  0xcf   :  { %439 = vtanh.f32 %v136_v26 }
  0xd8   :  { %v434_v27 = vpop.eup %433 }
  0xd9   :  { %403 = vmatprep.subr.mxu1 %v434_v27 }
  0xda   :  { %v436_v28 = vpop.eup %435  ;;  %404 = vmatpush3.msra.mxu1 %v434_v27 }
  0xdb   :  { %405 = vmatprep.subr.mxu1 %v436_v28  ;;  %v438_v29 = vpop.eup %437 }
  0xdc   :  { %406 = vmatpush3.msra.mxu1 %v436_v28  ;;  %v440_v30 = vpop.eup %439 }
  0xdd   :  { %407 = vmatprep.subr.mxu1 %v438_v29 }
  0xde   :  { %408 = vmatpush3.msra.mxu1 %v438_v29 }
  0xdf   :  { %409 = vmatprep.subr.mxu1 %v440_v30 }
  0xe0   :  { %410 = vmatpush3.msra.mxu1 %v440_v30 }
  0xe1   :  { %412 = vmatmul.mubr.msk.f32.vlgmr.msra.gmra.mxu1 %vm186_vm2, %v159_v31 }
  0xe2   :  { %414 = vmatprep.mubr.msk.f32.mxu1 %vm186_vm2, %v160_v32 }
  0xe5   :  { %415 = vmatmul.mubr.msk.f32.gmra.mxu1 %vm186_vm2, %v161_v33 }
 0x1a1   :  { %v413_v36 = vpop.f32.mrf.mxu1 }
 0x1a2   :  { %v271_v43 = vadd.f32 %v413_v36, %v174_v41 }
 0x1a3   :  { %v265_v38 = vpop.f32.mrf.mxu1 }
 0x1a4   :  { %v266_v46 = vadd.f32 %v265_v38, %v169_v45 }
 0x1a5   :  { %v416_v39 = vpop.f32.mrf.mxu1 }
 0x1a6   :  { %v281_v40 = vadd.f32 %v416_v39, %v184_v35 }
 0x1a7   :  { %v275_v42 = vpop.f32.mrf.mxu1 }
 0x1a8   :  { %441 = vtanh.f32 %v281_v40  ;;  %v276_v44 = vadd.f32 %v275_v42, %v179_v37 }
 0x1aa   :  { %443 = vtanh.f32 %v276_v44 }
 0x1ab   :  { %445 = vtanh.f32 %v271_v43 }
 0x1ac   :  { %447 = vtanh.f32 %v266_v46 }
 0x1b5   :  { %v442_v47 = vpop.eup %441 }
 0x1b6   :  { %418 = vmatpush3.msra.mxu0 %v442_v47 }
 0x1b7   :  { %v444_v48 = vpop.eup %443  ;;  %419 = vmatprep.subr.mxu0 %v450_v34 }
 0x1b8   :  { %420 = vmatpush3.msra.mxu0 %v444_v48  ;;  %v446_v49 = vpop.eup %445 }
 0x1b9   :  { %421 = vmatprep.subr.mxu0 %v450_v34  ;;  %v448_v51 = vpop.eup %447 }
 0x1ba   :  { %422 = vmatpush3.msra.mxu0 %v446_v49 }
 0x1bb   :  { %423 = vmatprep.subr.mxu0 %v450_v34 }
 0x1bc   :  { %424 = vmatpush3.msra.mxu0 %v448_v51 }
 0x1bd   :  { %426 = vmatmul.mubr.msk.f32.vlgmr.msra.gmra.mxu0 %vm186_vm2, %v288_v50 }
 0x27d   :  { %v358_v52 = vpop.f32.mrf.mxu0 }
 0x27e   :  { %362 = vst [vmem:[%s559_s6] sm:$0x3] %v358_v52 }
 0x27f   :  { %v427_v53 = vpop.f32.mrf.mxu0 }

</bundles_post_ra>
